<compile_context>
chip_gen: v7x
topology: tpu7x:2x2x1
jax: 0.10.0
libtpu: 0.0.40
codegen_flags: <defaults>
</compile_context>

<pallas_src>
import jax
import jax.numpy as jnp
from jax.experimental import pallas as pl
from jax.experimental.pallas import tpu as pltpu


def _round_up(x: int, m: int) -> int:
    return (x + m - 1) // m * m


# --------------------------------------------------------------------------- #
# Kernel
# --------------------------------------------------------------------------- #
def _linear_head_kernel(x_ref, w1_ref, shift_ref, w2_ref, b2_ref, o_ref, acc_ref):
    # x_ref:     (tm, tk)   f32 or bf16  flattened-input tile (cast in-kernel)
    # w1_ref:    (tk, Hp)   bf16  first linear weight tile, BN scale pre-folded
    # shift_ref: (1, Hp)    f32   folded BN shift = beta - mean * scale
    # w2_ref:    (Hp, Cp)   bf16  second linear weight (transposed vs torch)
    # b2_ref:    (1, Cp)    f32   second linear bias
    # o_ref:     (tm, Cp)   f32   logits tile (lane-dense, padded classes)
    # acc_ref:   (tm, Hp)   f32   VMEM accumulator across the D-reduction
    k = pl.program_id(1)

    @pl.when(k == 0)
    def _init():
        acc_ref[...] = jnp.zeros_like(acc_ref)

    acc_ref[...] += jnp.dot(x_ref[...].astype(jnp.bfloat16), w1_ref[...],
                            preferred_element_type=jnp.float32)

    @pl.when(k == pl.num_programs(1) - 1)
    def _epilogue():
        h = acc_ref[...] + shift_ref[...]          # BatchNorm1d (scale in w1)
        h = jnp.maximum(h, 0.0)                    # ReLU
        # Dropout(p=0.5) is identity in eval mode -> no-op.
        out = jnp.dot(h.astype(w2_ref.dtype), w2_ref[...],
                      preferred_element_type=jnp.float32) + b2_ref[...]
        o_ref[...] = out.astype(o_ref.dtype)


def _vmem_limit_bytes(tm, tk, hp, cp, x_itemsize):
    bf16, f32 = 2, 4
    need = (2 * tm * tk * x_itemsize   # x tile, double-buffered
            + 2 * tk * hp * bf16       # w1 tile, double-buffered
            + 2 * hp * cp * bf16       # w2 (resident; budget 2 bufs anyway)
            + 2 * hp * f32             # shift
            + 2 * cp * f32             # b2
            + 2 * tm * cp * f32        # output tile
            + tm * hp * f32)           # accumulator scratch
    # Cap at 48 MiB: safe under v7x's 64 MiB physical VMEM, far above the
    # 16 MiB v5e scoped default (explicit limit is mandatory there).
    return int(min(max(need + (8 << 20), 32 << 20), 48 << 20))


# --------------------------------------------------------------------------- #
# One-time weight preprocessing (model load)
# --------------------------------------------------------------------------- #
def prepare_linear_head_params(params, *, tk_max=4096):
    """Fold BN into w1, pad/cast all weights once. Call once per model."""
    w1t = params["w1t"]                             # (D, H)
    w2t = params["w2t"]                             # (H, C)
    b2 = params["b2"]                               # (C,)
    d, hidden = w1t.shape
    num_classes = w2t.shape[1]

    bn_scale = params["bn_gamma"] / jnp.sqrt(params["bn_var"] + params["bn_eps"])
    bn_shift = params["bn_beta"] - params["bn_mean"] * bn_scale
    w1_eff = w1t * bn_scale[None, :]                # fold BN scale into w1

    hp = _round_up(hidden, 128)                     # 576 -> 640
    cp = _round_up(num_classes, 128)                # 3   -> 128 (lane-dense)

    # Reduction tile: largest multiple-of-128 divisor of D_pad that is <= tk_max
    # (so the realistic D = 18432 case needs no x padding along D at all).
    d128 = _round_up(d, 128)
    if d128 <= tk_max:
        tk, dp = d128, d128
    else:
        tk = 128
        for cand in range(tk_max // 128, 0, -1):
            c = cand * 128
            if d128 % c == 0:
                tk = c
                break
        dp = d128

    f32, bf16 = jnp.float32, jnp.bfloat16
    w1_p = jnp.zeros((dp, hp), bf16).at[:d, :hidden].set(w1_eff.astype(bf16))
    sh_p = jnp.zeros((1, hp), f32).at[0, :hidden].set(bn_shift)
    w2_p = jnp.zeros((hp, cp), bf16).at[:hidden, :num_classes].set(w2t.astype(bf16))
    b2_p = jnp.zeros((1, cp), f32).at[0, :num_classes].set(b2)

    return {
        "w1_p": w1_p, "sh_p": sh_p, "w2_p": w2_p, "b2_p": b2_p,
        "d": d, "dp": dp, "tk": tk,
        "hidden": hidden, "hp": hp,
        "num_classes": num_classes, "cp": cp,
    }


# --------------------------------------------------------------------------- #
# Forward
# --------------------------------------------------------------------------- #
def linear_head_forward(x_nchw, prepped, *, tm_max=512):
    """x_nchw: (N, C, H, W) float32. prepped: output of prepare_linear_head_params."""
    n = x_nchw.shape[0]
    x2d = x_nchw.reshape(n, -1)                     # nn.Flatten() (row-major)
    d, dp, tk = prepped["d"], prepped["dp"], prepped["tk"]
    hp, cp = prepped["hp"], prepped["cp"]
    num_classes = prepped["num_classes"]
    assert x2d.shape[1] == d, (x2d.shape, d)

    w1_p, sh_p = prepped["w1_p"], prepped["sh_p"]
    w2_p, b2_p = prepped["w2_p"], prepped["b2_p"]

    # Big batch tiles -> w1 streams from HBM only ceil(N_pad/tm) times
    # (exactly once when N <= tm_max). 16-row alignment keeps bf16 sublane
    # packing dense when padding is needed.
    tm = min(tm_max, _round_up(n, 16))
    n_pad = _round_up(n, tm)

    if n_pad == n and dp == d:
        # Fast path: no per-call pad/cast pass over x; cast per-tile in-kernel.
        x_in = x2d
    else:
        x_in = jnp.zeros((n_pad, dp), jnp.bfloat16).at[:n, :d].set(
            x2d.astype(jnp.bfloat16))

    grid = (n_pad // tm, dp // tk)
    n_i = grid[0]
    x_itemsize = jnp.dtype(x_in.dtype).itemsize

    cost = pl.CostEstimate(
        flops=2 * n_pad * dp * hp + 2 * n_pad * hp * cp,
        transcendentals=0,
        bytes_accessed=(x_in.size * x_itemsize
                        + n_i * w1_p.size * 2          # w1 re-read per i-tile
                        + w2_p.size * 2
                        + (sh_p.size + b2_p.size) * 4
                        + n_pad * cp * 4),
    )

    out = pl.pallas_call(
        _linear_head_kernel,
        out_shape=jax.ShapeDtypeStruct((n_pad, cp), jnp.float32),
        grid_spec=pltpu.PrefetchScalarGridSpec(
            num_scalar_prefetch=0,
            grid=grid,
            in_specs=[
                pl.BlockSpec((tm, tk), lambda i, k: (i, k)),   # x
                pl.BlockSpec((tk, hp), lambda i, k: (k, 0)),   # w1 (BN folded)
                pl.BlockSpec((1, hp), lambda i, k: (0, 0)),    # bn shift
                pl.BlockSpec((hp, cp), lambda i, k: (0, 0)),   # w2t
                pl.BlockSpec((1, cp), lambda i, k: (0, 0)),    # b2
            ],
            out_specs=pl.BlockSpec((tm, cp), lambda i, k: (i, 0)),
            scratch_shapes=[pltpu.VMEM((tm, hp), jnp.float32)],
        ),
        compiler_params=pltpu.CompilerParams(
            dimension_semantics=("parallel", "arbitrary"),
            vmem_limit_bytes=_vmem_limit_bytes(tm, tk, hp, cp, x_itemsize),
        ),
        cost_estimate=cost,
    )(x_in, w1_p, sh_p, w2_p, b2_p)

    return out[:n, :num_classes]


# --------------------------------------------------------------------------- #
# Parameters / reference
# --------------------------------------------------------------------------- #
def init_params(key, in_dim, hidden, num_classes):
    """Deterministic synthetic parameters matching the torch module's shapes."""
    k1, k2, k3, k4, k5 = jax.random.split(key, 5)
    # torch stores Linear weights as (out, in); we keep the transposed layout.
    w1t = jax.random.normal(k1, (in_dim, hidden), jnp.float32) * 0.02
    w2t = jax.random.normal(k2, (hidden, num_classes), jnp.float32) * 0.02
    b2 = jax.random.normal(k3, (num_classes,), jnp.float32) * 0.02
    return {
        "w1t": w1t,
        "w2t": w2t,
        "b2": b2,
        "bn_gamma": jnp.ones((hidden,), jnp.float32),
        "bn_beta": jnp.zeros((hidden,), jnp.float32),
        "bn_mean": jax.random.normal(k4, (hidden,), jnp.float32) * 0.1,
        "bn_var": jnp.abs(jax.random.normal(k5, (hidden,), jnp.float32)) + 1.0,
        "bn_eps": jnp.float32(1e-5),
    }


def reference_forward(x_nchw, params):
    """Pure-JAX reference with the same bf16/BN-folding semantics as the kernel."""
    n = x_nchw.shape[0]
    x2d = x_nchw.reshape(n, -1)
    bn_scale = params["bn_gamma"] / jnp.sqrt(params["bn_var"] + params["bn_eps"])
    bn_shift = params["bn_beta"] - params["bn_mean"] * bn_scale
    w1_eff = (params["w1t"] * bn_scale[None, :]).astype(jnp.bfloat16)
    h = jnp.dot(x2d.astype(jnp.bfloat16), w1_eff,
                preferred_element_type=jnp.float32) + bn_shift
    h = jnp.maximum(h, 0.0)
    return jnp.dot(h.astype(jnp.bfloat16), params["w2t"].astype(jnp.bfloat16),
                   preferred_element_type=jnp.float32) + params["b2"]


if __name__ == "__main__":
    # Small shapes consistent with the module: input (N, C, H, W) flattened to
    # in_dim = C*H*W (small analogue of 2*64*9*16). The module's hidden width
    # 4*9*16 = 576 and num_classes = 3 are kept exactly.
    C, H, W = 2, 8, 16                  # in_dim = 256
    IN_DIM = C * H * W
    HIDDEN = 4 * 9 * 16                 # 576
    NUM_CLASSES = 3

    key = jax.random.PRNGKey(0)
    kx1, kx2, kp = jax.random.split(key, 3)
    params = init_params(kp, IN_DIM, HIDDEN, NUM_CLASSES)
    prepped = prepare_linear_head_params(params)    # one-time weight prep

    # Case 1: N=4 -> padded batch path (x padded/cast once in wrapper).
    x_a = jax.random.normal(kx1, (4, C, H, W), jnp.float32)
    out_a = jax.block_until_ready(linear_head_forward(x_a, prepped))
    ref_a = reference_forward(x_a, params)
    assert out_a.shape == (4, NUM_CLASSES), out_a.shape
    assert jnp.allclose(out_a, ref_a, atol=5e-3, rtol=5e-3), \
        jnp.max(jnp.abs(out_a - ref_a))

    # Case 2: N=16 -> fast path (no wrapper pad/cast; f32 x cast per-tile).
    x_b = jax.random.normal(kx2, (16, C, H, W), jnp.float32)
    out_b = jax.block_until_ready(linear_head_forward(x_b, prepped))
    ref_b = reference_forward(x_b, params)
    assert out_b.shape == (16, NUM_CLASSES), out_b.shape
    assert jnp.allclose(out_b, ref_b, atol=5e-3, rtol=5e-3), \
        jnp.max(jnp.abs(out_b - ref_b))

    print("KERNEL_OK")
</pallas_src>

<mosaic_0001>
module attributes {stable_mosaic.version = 11 : i64} {
  func.func @_linear_head_kernel(%arg0: i32, %arg1: i32, %arg2: memref<16x256xbf16, #tpu.memory_space<vmem>>, %arg3: memref<256x640xbf16, #tpu.memory_space<vmem>>, %arg4: memref<1x640xf32, #tpu.memory_space<vmem>>, %arg5: memref<640x128xbf16, #tpu.memory_space<vmem>>, %arg6: memref<1x128xf32, #tpu.memory_space<vmem>>, %arg7: memref<16x128xf32, #tpu.memory_space<vmem>>, %arg8: memref<16x640xf32, #tpu.memory_space<vmem>>) attributes {dimension_semantics = [#tpu.dimension_semantics<parallel>, #tpu.dimension_semantics<arbitrary>], iteration_bounds = array<i64: 1, 1>, scalar_prefetch = 0 : i64, scratch_operands = 1 : i64, tpu.core_type = #tpu.core_type<tc>, window_params = [{transform_indices = @transform_0, window_bounds = array<i64: 16, 256>}, {transform_indices = @transform_1, window_bounds = array<i64: 256, 640>}, {pipeline_mode = #tpu.pipeline_mode<synchronous>, transform_indices = @transform_2, window_bounds = array<i64: 1, 640>}, {pipeline_mode = #tpu.pipeline_mode<synchronous>, transform_indices = @transform_3, window_bounds = array<i64: 640, 128>}, {pipeline_mode = #tpu.pipeline_mode<synchronous>, transform_indices = @transform_4, window_bounds = array<i64: 1, 128>}, {transform_indices = @transform_5, window_bounds = array<i64: 16, 128>}]} {
    %c0_i32 = arith.constant 0 : i32
    %0 = arith.cmpi eq, %arg1, %c0_i32 : i32
    %1 = arith.extui %0 : i1 to i32
    %c0_i32_0 = arith.constant 0 : i32
    %2 = arith.cmpi ne, %1, %c0_i32_0 : i32
    scf.if %2 {
      %cst_10 = arith.constant 0.000000e+00 : f32
      %12 = vector.broadcast %cst_10 : f32 to vector<16x640xf32>
      %c0_11 = arith.constant 0 : index
      %c0_12 = arith.constant 0 : index
      %13 = vector.load %arg8[%c0_11, %c0_12] : memref<16x640xf32, #tpu.memory_space<vmem>>, vector<16x640xf32>
      tpu.vector_store %arg8[%c0_11, %c0_12], %12 {strides = array<i32>} : memref<16x640xf32, #tpu.memory_space<vmem>>, vector<16x640xf32>,
    } else {
    }
    %c0 = arith.constant 0 : index
    %c0_1 = arith.constant 0 : index
    %3 = vector.load %arg8[%c0, %c0_1] : memref<16x640xf32, #tpu.memory_space<vmem>>, vector<16x640xf32>
    %c0_2 = arith.constant 0 : index
    %c0_3 = arith.constant 0 : index
    %4 = vector.load %arg2[%c0_2, %c0_3] : memref<16x256xbf16, #tpu.memory_space<vmem>>, vector<16x256xbf16>
    %c0_4 = arith.constant 0 : index
    %c0_5 = arith.constant 0 : index
    %5 = vector.load %arg3[%c0_4, %c0_5] : memref<256x640xbf16, #tpu.memory_space<vmem>>, vector<256x640xbf16>
    %cst = arith.constant dense<0.000000e+00> : vector<16x640xf32>
    %6 = tpu.matmul %4, %5, %cst {dimension_numbers = #tpu.dot_dimension_numbers<[1], [0], [0], [1], [0, 0, 1, 1], [], []>} : vector<16x256xbf16>, vector<256x640xbf16>, vector<16x640xf32> -> vector<16x640xf32>
    %7 = arith.addf %3, %6 : vector<16x640xf32>
    %c0_6 = arith.constant 0 : index
    %c0_7 = arith.constant 0 : index
    %8 = vector.load %arg8[%c0_6, %c0_7] : memref<16x640xf32, #tpu.memory_space<vmem>>, vector<16x640xf32>
    tpu.vector_store %arg8[%c0_6, %c0_7], %7 {strides = array<i32>} : memref<16x640xf32, #tpu.memory_space<vmem>>, vector<16x640xf32>,
    %c0_i32_8 = arith.constant 0 : i32
    %9 = arith.cmpi eq, %arg1, %c0_i32_8 : i32
    %10 = arith.extui %9 : i1 to i32
    %c0_i32_9 = arith.constant 0 : i32
    %11 = arith.cmpi ne, %10, %c0_i32_9 : i32
    scf.if %11 {
      %c0_10 = arith.constant 0 : index
      %c0_11 = arith.constant 0 : index
      %12 = vector.load %arg8[%c0_10, %c0_11] : memref<16x640xf32, #tpu.memory_space<vmem>>, vector<16x640xf32>
      %c0_12 = arith.constant 0 : index
      %c0_13 = arith.constant 0 : index
      %13 = vector.load %arg4[%c0_12, %c0_13] : memref<1x640xf32, #tpu.memory_space<vmem>>, vector<1x640xf32>
      %14 = vector.broadcast %13 : vector<1x640xf32> to vector<16x640xf32>
      %15 = arith.addf %12, %14 : vector<16x640xf32>
      %cst_14 = arith.constant 0.000000e+00 : f32
      %16 = vector.broadcast %cst_14 : f32 to vector<16x640xf32>
      %17 = arith.maximumf %15, %16 : vector<16x640xf32>
      %18 = arith.truncf %17 : vector<16x640xf32> to vector<16x640xbf16>
      %c0_15 = arith.constant 0 : index
      %c0_16 = arith.constant 0 : index
      %19 = vector.load %arg5[%c0_15, %c0_16] : memref<640x128xbf16, #tpu.memory_space<vmem>>, vector<640x128xbf16>
      %cst_17 = arith.constant dense<0.000000e+00> : vector<16x128xf32>
      %20 = tpu.matmul %18, %19, %cst_17 {dimension_numbers = #tpu.dot_dimension_numbers<[1], [0], [0], [1], [0, 0, 1, 1], [], []>} : vector<16x640xbf16>, vector<640x128xbf16>, vector<16x128xf32> -> vector<16x128xf32>
      %c0_18 = arith.constant 0 : index
      %c0_19 = arith.constant 0 : index
      %21 = vector.load %arg6[%c0_18, %c0_19] : memref<1x128xf32, #tpu.memory_space<vmem>>, vector<1x128xf32>
      %22 = vector.broadcast %21 : vector<1x128xf32> to vector<16x128xf32>
      %23 = arith.addf %20, %22 : vector<16x128xf32>
      %c0_20 = arith.constant 0 : index
      %c0_21 = arith.constant 0 : index
      %24 = vector.load %arg7[%c0_20, %c0_21] : memref<16x128xf32, #tpu.memory_space<vmem>>, vector<16x128xf32>
      tpu.vector_store %arg7[%c0_20, %c0_21], %23 {strides = array<i32>} : memref<16x128xf32, #tpu.memory_space<vmem>>, vector<16x128xf32>,
    } else {
    }
    return
  }
  func.func @transform_0(%arg0: i32, %arg1: i32) -> (i32, i32) {
    %c0_i32 = arith.constant 0 : i32
    return %arg0, %arg1 : i32, i32
  }
  func.func @transform_1(%arg0: i32, %arg1: i32) -> (i32, i32) {
    %c0_i32 = arith.constant 0 : i32
    %c0_i32_0 = arith.constant 0 : i32
    return %arg1, %c0_i32 : i32, i32
  }
  func.func @transform_2(%arg0: i32, %arg1: i32) -> (i32, i32) {
    %c0_i32 = arith.constant 0 : i32
    %c0_i32_0 = arith.constant 0 : i32
    %c0_i32_1 = arith.constant 0 : i32
    return %c0_i32, %c0_i32_0 : i32, i32
  }
  func.func @transform_3(%arg0: i32, %arg1: i32) -> (i32, i32) {
    %c0_i32 = arith.constant 0 : i32
    %c0_i32_0 = arith.constant 0 : i32
    %c0_i32_1 = arith.constant 0 : i32
    return %c0_i32, %c0_i32_0 : i32, i32
  }
  func.func @transform_4(%arg0: i32, %arg1: i32) -> (i32, i32) {
    %c0_i32 = arith.constant 0 : i32
    %c0_i32_0 = arith.constant 0 : i32
    %c0_i32_1 = arith.constant 0 : i32
    return %c0_i32, %c0_i32_0 : i32, i32
  }
  func.func @transform_5(%arg0: i32, %arg1: i32) -> (i32, i32) {
    %c0_i32 = arith.constant 0 : i32
    %c0_i32_0 = arith.constant 0 : i32
    return %arg0, %c0_i32 : i32, i32
  }
}

</mosaic_0001>

<bundles_post_ra>
// kernel: tpu_custom_call.1
= control target key start
LH: loop header
LB: loop body
LE: loop exit
PB: predicated region body
PF: predicated region fallthrough
CT: control target
= control target key end

     0   :  { %10 = vsyncpa [#allocation4], 0  ;;  %s1895_s0 = inlined_call_operand.hbm [shape: bf16[16,256], index: 0, kind: input, shape index: {}]   ;;  %s1896_s1 = inlined_call_operand.hbm [shape: bf16[256,640], index: 1, kind: input, shape index: {}]   ;;  %s1897_s2 = inlined_call_operand.vmem [shape: f32[1,640], index: 2, kind: input, shape index: {}]   ;;  %s1898_s3 = inlined_call_operand.hbm [shape: bf16[640,128], index: 3, kind: input, shape index: {}]   ;;  %s1899_s4 = inlined_call_operand.vmem [shape: f32[1,128], index: 4, kind: input, shape index: {}]   ;;  %s1900_s5 = inlined_call_operand.hbm [shape: f32[16,128], index: 5, kind: output, shape index: {}]  }
   0x1   :  { %11 = vsyncpa [#allocation7], 0 }
   0x2   :  { %12 = vsyncpa [#allocation5], 0  ;;  %s1772_s18 = smov [#allocation6]   ;;  %s1678_s22 = scalar_lea.hbm %s1896_s1, 10240 }
   0x3   :  { %s30_s19 = sshll.u32 %s1772_s18, 4  ;;  %p1679_p0 = scmp.ne.s32.totalorder %s1896_s1, %s1678_s22  ;;  %s31_s19 = int_to_ptr.vmem [resolvable:$true] %s30_s19 }
   0x4   :  { %p1682_p1 = scmp.lt.u32.totalorder %s1678_s22, %s1896_s1 }
   0x6   :  { %p1684_p2 = pnand %p1682_p1, %p1679_p0 }
   0x8   :  { %1687 = shalt.err (!%p1684_p2)
}
   0x9   :  { %s1688_s27 = scalar_lea.vmem %s31_s19, 10240  ;;  %p1693_p4 = scmp.lt.s32.totalorder %s31_s19, %s31_s19 }
   0xa   :  { %p1689_p3 = scmp.ne.s32.totalorder %s31_s19, %s1688_s27  ;;  %p1694_p5 = scmp.lt.s32.totalorder %s1688_s27, %s1688_s27 }
   0xc   :  { %p1695_p6 = por %p1694_p5, %p1693_p4 }
   0xe   :  { %p1696_p7 = pnand %p1695_p6, %p1689_p3 }
  0x10   :  { %1699 = shalt.err (!%p1696_p7)
}
  0x11   :  { %s1773_s28 = smov 320   ;;  %s1774_s29 = smov 20  }
  0x12   :  { %36 = dma.hbm_to_vmem [thread:$0]  %s1896_s1, 10240, %s31_s19, [#allocation7], %s1773_s28, %s1773_s28, %s1774_s29  }
  0x13   :  { %s1775_s7 = smov [#allocation3]   ;;  %s1700_s11 = scalar_lea.hbm %s1895_s0, 256 }
  0x14   :  { %s18_s8 = sshll.u32 %s1775_s7, 4  ;;  %p1701_p8 = scmp.ne.s32.totalorder %s1895_s0, %s1700_s11  ;;  %s19_s8 = int_to_ptr.vmem [resolvable:$true] %s18_s8 }
  0x15   :  { %p1704_p9 = scmp.lt.u32.totalorder %s1700_s11, %s1895_s0 }
  0x17   :  { %p1706_p10 = pnand %p1704_p9, %p1701_p8 }
  0x19   :  { %1709 = shalt.err (!%p1706_p10)
}
  0x1a   :  { %s1710_s16 = scalar_lea.vmem %s19_s8, 256  ;;  %p1715_p12 = scmp.lt.s32.totalorder %s19_s8, %s19_s8 }
  0x1b   :  { %p1711_p11 = scmp.ne.s32.totalorder %s19_s8, %s1710_s16  ;;  %p1716_p13 = scmp.lt.s32.totalorder %s1710_s16, %s1710_s16 }
  0x1d   :  { %p1717_p0 = por %p1716_p13, %p1715_p12 }
  0x1f   :  { %p1718_p1 = pnand %p1717_p0, %p1711_p11 }
  0x21   :  { %1721 = shalt.err (!%p1718_p1)
}
  0x22   :  { %s1776_s1 = smov 128   ;;  %s1777_s17 = smov 8  }
  0x23   :  { %24 = dma.hbm_to_vmem [thread:$0]  %s1895_s0, 256, %s19_s8, [#allocation4], %s1776_s1, %s1776_s1, %s1777_s17  }
  0x24   :  { %s1778_s20 = smov [#allocation8]   ;;  %s1722_s24 = scalar_lea.hbm %s1898_s3, 5120 }
  0x25   :  { %s44_s21 = sshll.u32 %s1778_s20, 4  ;;  %p1723_p2 = scmp.ne.s32.totalorder %s1898_s3, %s1722_s24  ;;  %s45_s21 = int_to_ptr.vmem [resolvable:$true] %s44_s21 }
  0x26   :  { %p1726_p3 = scmp.lt.u32.totalorder %s1722_s24, %s1898_s3 }
  0x28   :  { %p1728_p4 = pnand %p1726_p3, %p1723_p2 }
  0x2a   :  { %1731 = shalt.err (!%p1728_p4)
}
  0x2b   :  { %s1732_s29 = scalar_lea.vmem %s45_s21, 5120  ;;  %p1737_p6 = scmp.lt.s32.totalorder %s45_s21, %s45_s21 }
  0x2c   :  { %p1733_p5 = scmp.ne.s32.totalorder %s45_s21, %s1732_s29  ;;  %p1738_p7 = scmp.lt.s32.totalorder %s1732_s29, %s1732_s29 }
  0x2e   :  { %p1739_p8 = por %p1738_p7, %p1737_p6 }
  0x30   :  { %p1740_p9 = pnand %p1739_p8, %p1733_p5 }
  0x32   :  { %1743 = shalt.err (!%p1740_p9)
}
  0x33   :  { %s1779_s0 = smov 64   ;;  %s1780_s30 = smov 4  }
  0x34   :  { %50 = dma.hbm_to_vmem [thread:$0]  %s1898_s3, 5120, %s45_s21, [#allocation7], %s1779_s0, %s1779_s0, %s1780_s30  }
  0x35   :  { %1766 = dma.done.wait [#allocation4], 256  }
  0x36   :  { %1767 = vsyncadd [#allocation4], 4294967040 }
  0x37   :  { %1768 = dma.done.wait [#allocation7], 15360  }
  0x38   :  { %1769 = vsyncadd [#allocation7], 4294951936  ;;  %v1523_v0 = vld [vmem:[#allocation6 + $0x4] ss:$20 sps:$4 sm:$0xff]   ;;  %v1525_v1 = vld [vmem:[#allocation6] ss:$20 sps:$4 sm:$0xff]  }
  0x39   :  { %611 = vmatprep.subr.bf16.mxu0 %v1523_v0  ;;  %v1526_v2 = vld [vmem:[#allocation6 + $0xc] ss:$20 sps:$4 sm:$0xff]   ;;  %v1528_v3 = vld [vmem:[#allocation6 + $0x8] ss:$20 sps:$4 sm:$0xff]   ;;  %v1534_v7 = vld [vmem:[#allocation6 + $0x30] ss:$20 sps:$4 sm:$0xff]  }
  0x3a   :  { %612 = vmatpush1.bf16.msra.mxu0 %v1525_v1  ;;  %v1529_v4 = vld [vmem:[#allocation6 + $0x2c] ss:$20 sps:$4 sm:$0xff]   ;;  %v1531_v5 = vld [vmem:[#allocation6 + $0x28] ss:$20 sps:$4 sm:$0xff]   ;;  %654 = vmatprep.subr.bf16.mxu1 %v1526_v2  ;;  %v1537_v9 = vld [vmem:[#allocation6 + $0x50] ss:$20 sps:$4 sm:$0xff]  }
  0x3b   :  { %v1532_v6 = vld [vmem:[#allocation6 + $0x34] ss:$20 sps:$4 sm:$0xff]   ;;  %655 = vmatpush1.bf16.msra.mxu1 %v1528_v3  ;;  %613 = vmatprep.subr.bf16.mxu0 %v1529_v4  ;;  %v1538_v10 = vld [vmem:[#allocation6 + $0x5c] ss:$20 sps:$4 sm:$0xff]   ;;  %v1540_v12 = vld [vmem:[#allocation6 + $0x58] ss:$20 sps:$4 sm:$0xff]  }
  0x3c   :  { %656 = vmatprep.subr.bf16.mxu1 %v1532_v6  ;;  %v1535_v8 = vld [vmem:[#allocation6 + $0x54] ss:$20 sps:$4 sm:$0xff]   ;;  %v1541_v11 = vld [vmem:[#allocation6 + $0x7c] ss:$20 sps:$4 sm:$0xff]   ;;  %v1544_v13 = vld [vmem:[#allocation6 + $0x84] ss:$20 sps:$4 sm:$0xff]  }
  0x3d   :  { %v1543_v14 = vld [vmem:[#allocation6 + $0x78] ss:$20 sps:$4 sm:$0xff]   ;;  %v1546_v16 = vld [vmem:[#allocation6 + $0x80] ss:$20 sps:$4 sm:$0xff]   ;;  %v1552_v20 = vld [vmem:[#allocation6 + $0xa8] ss:$20 sps:$4 sm:$0xff]  }
  0x3e   :  { %614 = vmatpush1.bf16.msra.mxu0 %v1531_v5  ;;  %v1547_v15 = vld [vmem:[#allocation6 + $0xa4] ss:$20 sps:$4 sm:$0xff]   ;;  %v1550_v17 = vld [vmem:[#allocation6 + $0xac] ss:$20 sps:$4 sm:$0xff]   ;;  %v1556_v21 = vld [vmem:[#allocation6 + $0xd4] ss:$20 sps:$4 sm:$0xff]  }
  0x3f   :  { %615 = vmatprep.subr.bf16.mxu0 %v1535_v8  ;;  %657 = vmatpush1.bf16.msra.mxu1 %v1534_v7  ;;  %v1549_v18 = vld [vmem:[#allocation6 + $0xa0] ss:$20 sps:$4 sm:$0xff]   ;;  %v1555_v22 = vld [vmem:[#allocation6 + $0xc8] ss:$20 sps:$4 sm:$0xff]   ;;  %v1558_v24 = vld [vmem:[#allocation6 + $0xd0] ss:$20 sps:$4 sm:$0xff]  }
  0x40   :  { %658 = vmatprep.subr.bf16.mxu1 %v1538_v10  ;;  %v1553_v19 = vld [vmem:[#allocation6 + $0xcc] ss:$20 sps:$4 sm:$0xff]   ;;  %v1559_v23 = vld [vmem:[#allocation6 + $0xf4] ss:$20 sps:$4 sm:$0xff]   ;;  %v1562_v25 = vld [vmem:[#allocation6 + $0xfc] ss:$20 sps:$4 sm:$0xff]  }
  0x41   :  { %v1561_v26 = vld [vmem:[#allocation6 + $0xf0] ss:$20 sps:$4 sm:$0xff]   ;;  %v1564_v28 = vld [vmem:[#allocation6 + $0xf8] ss:$20 sps:$4 sm:$0xff]   ;;  %v1570_v32 = vld [vmem:[#allocation6 + $0x120] ss:$20 sps:$4 sm:$0xff]  }
  0x42   :  { %616 = vmatpush1.bf16.msra.mxu0 %v1537_v9  ;;  %v1565_v27 = vld [vmem:[#allocation6 + $0x11c] ss:$20 sps:$4 sm:$0xff]   ;;  %v1568_v29 = vld [vmem:[#allocation6 + $0x124] ss:$20 sps:$4 sm:$0xff]   ;;  %v1574_v33 = vld [vmem:[#allocation6 + $0x14c] ss:$20 sps:$4 sm:$0xff]  }
  0x43   :  { %617 = vmatprep.subr.bf16.mxu0 %v1541_v11  ;;  %659 = vmatpush1.bf16.msra.mxu1 %v1540_v12  ;;  %v1567_v30 = vld [vmem:[#allocation6 + $0x118] ss:$20 sps:$4 sm:$0xff]   ;;  %v1573_v34 = vld [vmem:[#allocation6 + $0x140] ss:$20 sps:$4 sm:$0xff]   ;;  %v1576_v36 = vld [vmem:[#allocation6 + $0x148] ss:$20 sps:$4 sm:$0xff]  }
  0x44   :  { %660 = vmatprep.subr.bf16.mxu1 %v1544_v13  ;;  %v1571_v31 = vld [vmem:[#allocation6 + $0x144] ss:$20 sps:$4 sm:$0xff]   ;;  %v1577_v35 = vld [vmem:[#allocation6 + $0x16c] ss:$20 sps:$4 sm:$0xff]   ;;  %v1580_v37 = vld [vmem:[#allocation6 + $0x174] ss:$20 sps:$4 sm:$0xff]  }
  0x45   :  { %v1579_v38 = vld [vmem:[#allocation6 + $0x168] ss:$20 sps:$4 sm:$0xff]   ;;  %v1582_v40 = vld [vmem:[#allocation6 + $0x170] ss:$20 sps:$4 sm:$0xff]   ;;  %v1588_v44 = vld [vmem:[#allocation6 + $0x198] ss:$20 sps:$4 sm:$0xff]  }
  0x46   :  { %618 = vmatpush1.bf16.msra.mxu0 %v1543_v14  ;;  %v1583_v39 = vld [vmem:[#allocation6 + $0x194] ss:$20 sps:$4 sm:$0xff]   ;;  %v1586_v41 = vld [vmem:[#allocation6 + $0x19c] ss:$20 sps:$4 sm:$0xff]   ;;  %v1592_v45 = vld [vmem:[#allocation6 + $0x1c4] ss:$20 sps:$4 sm:$0xff]  }
  0x47   :  { %619 = vmatprep.subr.bf16.mxu0 %v1547_v15  ;;  %661 = vmatpush1.bf16.msra.mxu1 %v1546_v16  ;;  %v1585_v42 = vld [vmem:[#allocation6 + $0x190] ss:$20 sps:$4 sm:$0xff]   ;;  %v1591_v46 = vld [vmem:[#allocation6 + $0x1b8] ss:$20 sps:$4 sm:$0xff]   ;;  %v1594_v47 = vld [vmem:[#allocation6 + $0x1c0] ss:$20 sps:$4 sm:$0xff]  }
  0x48   :  { %662 = vmatprep.subr.bf16.mxu1 %v1550_v17  ;;  %v1589_v43 = vld [vmem:[#allocation6 + $0x1bc] ss:$20 sps:$4 sm:$0xff]   ;;  %v1595_v49 = vld [vmem:[#allocation6 + $0x1e4] ss:$20 sps:$4 sm:$0xff]   ;;  %v1597_v50 = vld [vmem:[#allocation6 + $0x1e0] ss:$20 sps:$4 sm:$0xff]  }
  0x49   :  { %v1618_v48 = vld [vmem:[#allocation3 + $0x4] ss:$8 sps:$4 sm:$0xff]   ;;  %v1598_v51 = vld [vmem:[#allocation6 + $0x1ec] ss:$20 sps:$4 sm:$0xff]   ;;  %v1606_v56 = vld [vmem:[#allocation6 + $0x210] ss:$20 sps:$4 sm:$0xff]  }
  0x4a   :  { %620 = vmatpush1.bf16.msra.mxu0 %v1549_v18  ;;  %643 = vmatprep.mubr.bf16.mxu0 %v1618_v48  ;;  %v1600_v52 = vld [vmem:[#allocation6 + $0x1e8] ss:$20 sps:$4 sm:$0xff]   ;;  %v1601_v53 = vld [vmem:[#allocation6 + $0x20c] ss:$20 sps:$4 sm:$0xff]   ;;  %v1609_v58 = vld [vmem:[#allocation6 + $0x230] ss:$20 sps:$4 sm:$0xff]  }
  0x4b   :  { %621 = vmatprep.subr.bf16.mxu0 %v1553_v19  ;;  %663 = vmatpush1.bf16.msra.mxu1 %v1552_v20  ;;  %v1603_v54 = vld [vmem:[#allocation6 + $0x208] ss:$20 sps:$4 sm:$0xff]   ;;  %v1612_v60 = vld [vmem:[#allocation6 + $0x238] ss:$20 sps:$4 sm:$0xff]   ;;  %v1620_v0 = vld [vmem:[#allocation6 + $0x260] ss:$20 sps:$4 sm:$0xff]  }
  0x4c   :  { %664 = vmatprep.subr.bf16.mxu1 %v1556_v21  ;;  %686 = vmatprep.mubr.bf16.mxu1 %v1618_v48  ;;  %v1604_v55 = vld [vmem:[#allocation6 + $0x214] ss:$20 sps:$4 sm:$0xff]   ;;  %v1610_v59 = vld [vmem:[#allocation6 + $0x23c] ss:$20 sps:$4 sm:$0xff]   ;;  %v1615_v62 = vld [vmem:[#allocation6 + $0x258] ss:$20 sps:$4 sm:$0xff]  }
  0x4d   :  { %v1607_v57 = vld [vmem:[#allocation6 + $0x234] ss:$20 sps:$4 sm:$0xff]   ;;  %v1613_v61 = vld [vmem:[#allocation6 + $0x25c] ss:$20 sps:$4 sm:$0xff]   ;;  %v1616_v63 = vld [vmem:[#allocation6 + $0x264] ss:$20 sps:$4 sm:$0xff]  }
  0x4e   :  { %622 = vmatpush1.bf16.msra.mxu0 %v1555_v22  ;;  %v1622_v1 = vld [vmem:[#allocation6 + $0x150] ss:$20 sps:$4 sm:$0xff]   ;;  %v1624_v5 = vld [vmem:[#allocation6 + $0x178] ss:$20 sps:$4 sm:$0xff]   ;;  %v1626_v9 = vld [vmem:[#allocation6 + $0x1a0] ss:$20 sps:$4 sm:$0xff]  }
  0x4f   :  { %623 = vmatprep.subr.bf16.mxu0 %v1559_v23  ;;  %665 = vmatpush1.bf16.msra.mxu1 %v1558_v24  ;;  %v1853_v2 = vld [vmem:[#allocation3] ss:$8 sps:$4 sm:$0xff]   ;;  %v1638_v3 = vld [vmem:[#allocation8 + $0x40] sm:$0xff]   ;;  %v1642_v7 = vld [vmem:[#allocation8 + $0x48] sm:$0xff]   ;;  %vm1782_vm0 = vmmov 0   ;;  %s1783_s10 = smov [#allocation9]  }
  0x50   :  { %666 = vmatprep.subr.bf16.mxu1 %v1562_v25  ;;  %v1623_v4 = vld [vmem:[#allocation6 + $0x10] ss:$20 sps:$4 sm:$0xff]   ;;  %v1625_v8 = vld [vmem:[#allocation6 + $0x38] ss:$20 sps:$4 sm:$0xff]   ;;  %v1627_v12 = vld [vmem:[#allocation6 + $0x60] ss:$20 sps:$4 sm:$0xff]  }
  0x51   :  { %v1639_v6 = vld [vmem:[#allocation8] sm:$0xff]   ;;  %v1643_v10 = vld [vmem:[#allocation8 + $0x8] sm:$0xff]   ;;  %v1646_v11 = vld [vmem:[#allocation8 + $0x50] sm:$0xff]   ;;  %s1280_s11 = sshll.u32 %s1783_s10, 4  ;;  %s1281_s11 = int_to_ptr.vmem [resolvable:$true] %s1280_s11 }
  0x52   :  { %624 = vmatpush1.bf16.msra.mxu0 %v1561_v26  ;;  %v1628_v13 = vld [vmem:[#allocation6 + $0x1c8] ss:$20 sps:$4 sm:$0xff]   ;;  %v1647_v14 = vld [vmem:[#allocation8 + $0x10] sm:$0xff]   ;;  %v1632_v20 = vld [vmem:[#allocation6 + $0x218] ss:$20 sps:$4 sm:$0xff]   ;;  %p1749_p11 = scmp.lt.s32.totalorder %s1281_s11, %s1281_s11 }
  0x53   :  { %625 = vmatprep.subr.bf16.mxu0 %v1565_v27  ;;  %667 = vmatpush1.bf16.msra.mxu1 %v1564_v28  ;;  %v1650_v15 = vld [vmem:[#allocation8 + $0x58] sm:$0xff]   ;;  %v1630_v17 = vld [vmem:[#allocation6 + $0x1f0] ss:$20 sps:$4 sm:$0xff]   ;;  %v1658_v23 = vld [vmem:[#allocation8 + $0x68] sm:$0xff]  }
  0x54   :  { %668 = vmatprep.subr.bf16.mxu1 %v1568_v29  ;;  %v1629_v16 = vld [vmem:[#allocation6 + $0x88] ss:$20 sps:$4 sm:$0xff]   ;;  %v1631_v18 = vld [vmem:[#allocation6 + $0xb0] ss:$20 sps:$4 sm:$0xff]   ;;  %v1633_v24 = vld [vmem:[#allocation6 + $0xd8] ss:$20 sps:$4 sm:$0xff]  }
  0x55   :  { %v1651_v19 = vld [vmem:[#allocation8 + $0x18] sm:$0xff]   ;;  %v1654_v21 = vld [vmem:[#allocation8 + $0x60] sm:$0xff]  }
  0x56   :  { %626 = vmatpush1.bf16.msra.mxu0 %v1567_v30  ;;  %v1655_v22 = vld [vmem:[#allocation8 + $0x20] sm:$0xff]   ;;  %v1636_v27 = vld [vmem:[#allocation6 + $0x268] ss:$20 sps:$4 sm:$0xff]  }
  0x57   :  { %627 = vmatprep.subr.bf16.mxu0 %v1571_v31  ;;  %669 = vmatpush1.bf16.msra.mxu1 %v1570_v32  ;;  %v1634_v25 = vld [vmem:[#allocation6 + $0x240] ss:$20 sps:$4 sm:$0xff]   ;;  %v1637_v28 = vld [vmem:[#allocation6 + $0x128] ss:$20 sps:$4 sm:$0xff]  }
  0x58   :  { %670 = vmatprep.subr.bf16.mxu1 %v1574_v33  ;;  %v1635_v26 = vld [vmem:[#allocation6 + $0x100] ss:$20 sps:$4 sm:$0xff]   ;;  %v1644_v31 = vld [vmem:[#allocation8 + $0xc8] sm:$0xff]  }
  0x59   :  { %v1640_v29 = vld [vmem:[#allocation8 + $0xc0] sm:$0xff]   ;;  %v1645_v32 = vld [vmem:[#allocation8 + $0x88] sm:$0xff]   ;;  %v1648_v33 = vld [vmem:[#allocation8 + $0xd0] sm:$0xff]  }
  0x5a   :  { %628 = vmatpush1.bf16.msra.mxu0 %v1573_v34  ;;  %v1641_v30 = vld [vmem:[#allocation8 + $0x80] sm:$0xff]   ;;  %v1649_v34 = vld [vmem:[#allocation8 + $0x90] sm:$0xff]  }
  0x5b   :  { %629 = vmatprep.subr.bf16.mxu0 %v1577_v35  ;;  %671 = vmatpush1.bf16.msra.mxu1 %v1576_v36  ;;  %v1652_v35 = vld [vmem:[#allocation8 + $0xd8] sm:$0xff]  }
  0x5c   :  { %672 = vmatprep.subr.bf16.mxu1 %v1580_v37  ;;  %v1653_v36 = vld [vmem:[#allocation8 + $0x98] sm:$0xff]   ;;  %v1656_v37 = vld [vmem:[#allocation8 + $0xe0] sm:$0xff]  }
  0x5e   :  { %630 = vmatpush1.bf16.msra.mxu0 %v1579_v38  ;;  %v1657_v38 = vld [vmem:[#allocation8 + $0xa0] sm:$0xff]  }
  0x5f   :  { %631 = vmatprep.subr.bf16.mxu0 %v1583_v39  ;;  %673 = vmatpush1.bf16.msra.mxu1 %v1582_v40  ;;  %v1659_v39 = vld [vmem:[#allocation8 + $0x28] sm:$0xff]  }
  0x60   :  { %674 = vmatprep.subr.bf16.mxu1 %v1586_v41  ;;  %v1660_v40 = vld [vmem:[#allocation8 + $0xe8] sm:$0xff]  }
  0x61   :  { %v1661_v41 = vld [vmem:[#allocation8 + $0xa8] sm:$0xff]  }
  0x62   :  { %632 = vmatpush1.bf16.msra.mxu0 %v1585_v42  ;;  %v1662_v42 = vld [vmem:[#allocation8 + $0x70] sm:$0xff]  }
  0x63   :  { %633 = vmatprep.subr.bf16.mxu0 %v1589_v43  ;;  %675 = vmatpush1.bf16.msra.mxu1 %v1588_v44  ;;  %v1663_v43 = vld [vmem:[#allocation8 + $0x30] sm:$0xff]  }
  0x64   :  { %676 = vmatprep.subr.bf16.mxu1 %v1592_v45  ;;  %v1664_v44 = vld [vmem:[#allocation8 + $0xf0] sm:$0xff]  }
  0x65   :  { %v1665_v45 = vld [vmem:[#allocation8 + $0xb0] sm:$0xff]  }
  0x66   :  { %634 = vmatpush1.bf16.msra.mxu0 %v1591_v46  ;;  %v1666_v46 = vld [vmem:[#allocation8 + $0x78] sm:$0xff]  }
  0x67   :  { %635 = vmatprep.subr.bf16.mxu0 %v1595_v49  ;;  %677 = vmatpush1.bf16.msra.mxu1 %v1594_v47  ;;  %v1667_v47 = vld [vmem:[#allocation8 + $0x38] sm:$0xff]  }
  0x68   :  { %678 = vmatprep.subr.bf16.mxu1 %v1598_v51  ;;  %v1669_v49 = vld [vmem:[#allocation8 + $0xb8] sm:$0xff]   ;;  %v773_v51 = vlaneseq }
  0x6a   :  { %636 = vmatpush1.bf16.msra.mxu0 %v1597_v50  ;;  %v1781_v50 = vmov 0.0  }
  0x6b   :  { %637 = vmatprep.subr.bf16.mxu0 %v1601_v53  ;;  %679 = vmatpush1.bf16.msra.mxu1 %v1600_v52  ;;  %v1859_v52 = vshrl.u32 %v773_v51, 7 }
  0x6c   :  { %680 = vmatprep.subr.bf16.mxu1 %v1604_v55 }
  0x6d   :  { %v775_v53 = vsub.s32 0, %v1859_v52  ;;  %v779_v55 = vsub.s32 1, %v1859_v52 }
  0x6e   :  { %638 = vmatpush1.bf16.msra.mxu0 %v1603_v54  ;;  %v771_v54 = vld [vmem:[%s1897_s2] sm:$0x1f] }
  0x6f   :  { %639 = vmatprep.subr.bf16.mxu0 %v1607_v57  ;;  %681 = vmatpush1.bf16.msra.mxu1 %v1606_v56  ;;  %v783_v56 = vsub.s32 2, %v1859_v52  ;;  %v787_v57 = vsub.s32 3, %v1859_v52 }
  0x70   :  { %682 = vmatprep.subr.bf16.mxu1 %v1610_v59  ;;  %v780_v59 = vrot.slane %v771_v54, %v779_v55 }
  0x72   :  { %640 = vmatpush1.bf16.msra.mxu0 %v1609_v58  ;;  %v776_v58 = vrot.slane %v771_v54, %v775_v53 }
  0x73   :  { %641 = vmatprep.subr.bf16.mxu0 %v1613_v61  ;;  %683 = vmatpush1.bf16.msra.mxu1 %v1612_v60  ;;  %v784_v60 = vrot.slane %v771_v54, %v783_v56 }
  0x74   :  { %684 = vmatprep.subr.bf16.mxu1 %v1616_v63 }
  0x76   :  { %642 = vmatpush1.bf16.msra.mxu0 %v1615_v62  ;;  %v788_v62 = vrot.slane %v771_v54, %v787_v57 }
  0x77   :  { %1416 = vmatprep.subr.bf16.mxu0 %v1622_v1  ;;  %685 = vmatpush1.bf16.msra.mxu1 %v1620_v0 }
  0x78   :  { %1438 = vmatprep.subr.bf16.mxu1 %v1638_v3 }
  0x79   :  { %644 = vmatmul.mubr.bf16.vlgmr.msra.gmra.mrb[0].mxu0 %v1853_v2 }
  0x7a   :  { %1417 = vmatpush3.bf16.msra.mxu0 %v1623_v4  ;;  %729 = vmatprep.mubr.bf16.mxu0 %v1618_v48  ;;  %v1668_v48 = vld [vmem:[#allocation8 + $0xf8] sm:$0xff]  }
  0x7b   :  { %687 = vmatmul.mubr.bf16.vlgmr.msra.gmra.mrb[0].mxu1 %v1853_v2  ;;  %1418 = vmatprep.subr.bf16.mxu0 %v1624_v5 }
  0x7c   :  { %1439 = vmatpush3.bf16.msra.mxu1 %v1639_v6 }
  0x7d   :  { %1440 = vmatprep.subr.bf16.mxu1 %v1642_v7 }
  0x7e   :  { %1419 = vmatpush3.bf16.msra.mxu0 %v1625_v8 }
  0x7f   :  { %1420 = vmatprep.subr.bf16.mxu0 %v1626_v9 }
  0x80   :  { %1441 = vmatpush3.bf16.msra.mxu1 %v1643_v10 }
  0x81   :  { %1442 = vmatprep.subr.bf16.mxu1 %v1646_v11 }
  0x82   :  { %1421 = vmatpush3.bf16.msra.mxu0 %v1627_v12 }
  0x83   :  { %1422 = vmatprep.subr.bf16.mxu0 %v1628_v13 }
  0x84   :  { %1443 = vmatpush3.bf16.msra.mxu1 %v1647_v14 }
  0x85   :  { %1444 = vmatprep.subr.bf16.mxu1 %v1650_v15 }
  0x86   :  { %1423 = vmatpush3.bf16.msra.mxu0 %v1629_v16 }
  0x87   :  { %1424 = vmatprep.subr.bf16.mxu0 %v1630_v17 }
  0x88   :  { %1445 = vmatpush3.bf16.msra.mxu1 %v1651_v19 }
  0x89   :  { %1446 = vmatprep.subr.bf16.mxu1 %v1654_v21 }
  0x8a   :  { %1425 = vmatpush3.bf16.msra.mxu0 %v1631_v18 }
  0x8b   :  { %1426 = vmatprep.subr.bf16.mxu0 %v1632_v20 }
  0x8c   :  { %1447 = vmatpush3.bf16.msra.mxu1 %v1655_v22 }
  0x8d   :  { %1448 = vmatprep.subr.bf16.mxu1 %v1658_v23 }
  0x8e   :  { %1427 = vmatpush3.bf16.msra.mxu0 %v1633_v24  ;;  %v1670_v24 = vld [vmem:[#allocation8 + $0x100] sm:$0xff]  }
  0x8f   :  { %1428 = vmatprep.subr.bf16.mxu0 %v1634_v25 }
  0x90   :  { %1449 = vmatpush3.bf16.msra.mxu1 %v1659_v39 }
  0x91   :  { %1450 = vmatprep.subr.bf16.mxu1 %v1662_v42  ;;  %v1677_v42 = vld [vmem:[#allocation8 + $0x138] sm:$0xff]  }
  0x92   :  { %1429 = vmatpush3.bf16.msra.mxu0 %v1635_v26 }
  0x93   :  { %1430 = vmatprep.subr.bf16.mxu0 %v1636_v27  ;;  %v1671_v27 = vld [vmem:[#allocation8 + $0x108] sm:$0xff]  }
  0x94   :  { %1451 = vmatpush3.bf16.msra.mxu1 %v1663_v43 }
  0x95   :  { %1452 = vmatprep.subr.bf16.mxu1 %v1666_v46 }
  0x96   :  { %1431 = vmatpush3.bf16.msra.mxu0 %v1637_v28  ;;  %v1672_v28 = vld [vmem:[#allocation8 + $0x110] sm:$0xff]  }
  0x97   :  { %1460 = vmatprep.subr.bf16.mxu0 %v1640_v29  ;;  %v1673_v29 = vld [vmem:[#allocation8 + $0x118] sm:$0xff]  }
  0x98   :  { %1453 = vmatpush3.bf16.msra.mxu1 %v1667_v47 }
  0x99   :  { %730 = vmatmul.mubr.bf16.vlgmr.msra.gmra.mrb[4].mxu0 %v1853_v2  ;;  %1491 = vmatprep.subr.bf16.mxu1 %v1781_v50 }
  0x9a   :  { %1461 = vmatpush3.bf16.msra.mxu0 %v1641_v30  ;;  %v1674_v30 = vld [vmem:[#allocation8 + $0x120] sm:$0xff]  }
  0x9b   :  { %1462 = vmatprep.subr.bf16.mxu0 %v1644_v31  ;;  %v791_v31 = vsub.s32 4, %v1859_v52 }
  0x9e   :  { %1463 = vmatpush3.bf16.msra.mxu0 %v1645_v32  ;;  %v1675_v32 = vld [vmem:[#allocation8 + $0x128] sm:$0xff]  }
  0x9f   :  { %1464 = vmatprep.subr.bf16.mxu0 %v1648_v33 }
  0xa2   :  { %1465 = vmatpush3.bf16.msra.mxu0 %v1649_v34  ;;  %v792_v34 = vrot.slane %v771_v54, %v791_v31 }
  0xa3   :  { %1466 = vmatprep.subr.bf16.mxu0 %v1652_v35  ;;  %v1676_v35 = vld [vmem:[#allocation8 + $0x130] sm:$0xff]  }
  0xa6   :  { %1467 = vmatpush3.bf16.msra.mxu0 %v1653_v36 }
  0xa7   :  { %1468 = vmatprep.subr.bf16.mxu0 %v1656_v37 }
  0xaa   :  { %1469 = vmatpush3.bf16.msra.mxu0 %v1657_v38 }
  0xab   :  { %1470 = vmatprep.subr.bf16.mxu0 %v1660_v40 }
  0xae   :  { %1471 = vmatpush3.bf16.msra.mxu0 %v1661_v41 }
  0xaf   :  { %1472 = vmatprep.subr.bf16.mxu0 %v1664_v44 }
  0xb2   :  { %1473 = vmatpush3.bf16.msra.mxu0 %v1665_v45 }
  0xb3   :  { %1474 = vmatprep.subr.bf16.mxu0 %v1668_v48  ;;  %v1375_v48 = vld [vmem:[%s1899_s4] ss:$0 sm:$0xff]  ;;  %s1744_s4 = scalar_lea.vmem %s1281_s11, 256 }
  0xb4   :  { %p1745_p10 = scmp.ne.s32.totalorder %s1281_s11, %s1744_s4  ;;  %p1750_p12 = scmp.lt.s32.totalorder %s1744_s4, %s1744_s4 }
  0xb6   :  { %1475 = vmatpush3.bf16.msra.mxu0 %v1669_v49  ;;  %p1751_p13 = por %p1750_p12, %p1749_p11 }
  0xb8   :  { %p1752_p0 = pnand %p1751_p13, %p1745_p10 }
 0x14c   :  { %v645_v61 = vpop.f32.mrb[0].mxu0 }
 0x14d   :  { %v798_v63 = vadd.f32 %v776_v58, %v645_v61  ;;  %v647_v0 = vpop.f32.mrb[1].mxu0 }
 0x14e   :  { %v799_v1 = vadd.f32 %v780_v59, %v647_v0  ;;  %v649_v2 = vpop.f32.mrb[2].mxu0  ;;  %v688_v3 = vpop.f32.mrb[0].mxu1 }
 0x14f   :  { %v808_v4 = vmax.f32 %v798_v63, 0.0  ;;  %v803_v5 = vadd.f32 %v776_v58, %v649_v2  ;;  %v800_v6 = vadd.f32 %v784_v60, %v688_v3  ;;  %v651_v7 = vpop.f32.mrb[3].mxu0  ;;  %v690_v8 = vpop.f32.mrb[1].mxu1 }
 0x150   :  { %v804_v9 = vadd.f32 %v780_v59, %v651_v7  ;;  %v801_v10 = vadd.f32 %v788_v62, %v690_v8  ;;  %v692_v11 = vpop.f32.mrb[2].mxu1  ;;  %v809_v16 = vmax.f32 %v799_v1, 0.0 }
 0x151   :  { %v813_v12 = vmax.f32 %v803_v5, 0.0  ;;  %v810_v13 = vmax.f32 %v800_v6, 0.0  ;;  %v805_v14 = vadd.f32 %v784_v60, %v692_v11  ;;  %v694_v15 = vpop.f32.mrb[3].mxu1 }
 0x152   :  { %v814_v17 = vmax.f32 %v804_v9, 0.0  ;;  %v811_v18 = vmax.f32 %v801_v10, 0.0  ;;  %v806_v19 = vadd.f32 %v788_v62, %v694_v15 }
 0x153   :  { %v818_v20 = vpack.c.bf16 %v813_v12, %v808_v4  ;;  %v815_v21 = vmax.f32 %v805_v14, 0.0 }
 0x154   :  { %v819_v22 = vpack.c.bf16 %v814_v17, %v809_v16  ;;  %v816_v23 = vmax.f32 %v806_v19, 0.0 }
 0x155   :  { %v820_v25 = vpack.c.bf16 %v815_v21, %v810_v13 }
 0x156   :  { %v821_v26 = vpack.c.bf16 %v816_v23, %v811_v18  ;;  %1182 = vmatprep.mubr.bf16.mxu1 %v819_v22 }
 0x157   :  { %1183 = vmatmul.mubr.bf16.vlgmr.msra.gmra.mrb[4].mxu1 %v818_v20 }
 0x158   :  { %1223 = vmatprep.mubr.bf16.mxu0 %v821_v26  ;;  %1492 = vmatpush3.bf16.msra.mxu1 %v1670_v24 }
 0x159   :  { %1224 = vmatmul.mubr.bf16.vlgmr.msra.gmra.mrb[8].mxu0 %v820_v25  ;;  %1493 = vmatprep.subr.bf16.mxu1 %v1781_v50 }
 0x15a   :  { %1507 = vmatprep.mubr.msk.bf16.mxu1 %vm1782_vm0, %v1781_v50 }
 0x15c   :  { %1494 = vmatpush3.bf16.msra.mxu1 %v1671_v27 }
 0x15d   :  { %1495 = vmatprep.subr.bf16.mxu1 %v1781_v50 }
 0x160   :  { %1496 = vmatpush3.bf16.msra.mxu1 %v1672_v28 }
 0x161   :  { %1497 = vmatprep.subr.bf16.mxu1 %v1781_v50 }
 0x164   :  { %1498 = vmatpush3.bf16.msra.mxu1 %v1673_v29 }
 0x165   :  { %1499 = vmatprep.subr.bf16.mxu1 %v1781_v50 }
 0x168   :  { %1500 = vmatpush3.bf16.msra.mxu1 %v1674_v30 }
 0x169   :  { %1501 = vmatprep.subr.bf16.mxu1 %v1781_v50 }
 0x16c   :  { %v1432_v33 = vpop.f32.mrb[4].mxu0  ;;  %1502 = vmatpush3.bf16.msra.mxu1 %v1675_v32 }
 0x16d   :  { %v1433_v36 = vpop.f32.mrb[5].mxu0  ;;  %1503 = vmatprep.subr.bf16.mxu1 %v1781_v50 }
 0x16e   :  { %v1434_v37 = vadd.f32 %v1433_v36, %v1432_v33  ;;  %v1435_v38 = vpop.f32.mrb[6].mxu0 }
 0x16f   :  { %v1436_v39 = vpop.f32.mrb[7].mxu0 }
 0x170   :  { %v802_v40 = vadd.f32 %v1434_v37, %v792_v34  ;;  %v1437_v41 = vadd.f32 %v1436_v39, %v1435_v38  ;;  %1504 = vmatpush3.bf16.msra.mxu1 %v1676_v35 }
 0x171   :  { %1505 = vmatprep.subr.bf16.mxu1 %v1781_v50 }
 0x172   :  { %v807_v43 = vadd.f32 %v1437_v41, %v792_v34  ;;  %v812_v44 = vmax.f32 %v802_v40, 0.0 }
 0x174   :  { %v817_v45 = vmax.f32 %v807_v43, 0.0  ;;  %1506 = vmatpush3.bf16.msra.mxu1 %v1677_v42 }
 0x176   :  { %v822_v46 = vpack.c.bf16 %v817_v45, %v812_v44 }
 0x178   :  { %1508 = vmatmul.mubr.bf16.vlgmr.msra.gmra.mrb[8].mxu1 %v822_v46 }
 0x22a   :  { %v1454_v47 = vpop.f32.mrb[4].mxu1 }
 0x22b   :  { %v1455_v49 = vpop.f32.mrb[5].mxu1 }
 0x22c   :  { %v1456_v51 = vadd.f32 %v1455_v49, %v1454_v47  ;;  %v1457_v52 = vpop.f32.mrb[6].mxu1  ;;  %v1476_v53 = vpop.f32.mrb[8].mxu0 }
 0x22d   :  { %v1458_v54 = vpop.f32.mrb[7].mxu1  ;;  %v1477_v55 = vpop.f32.mrb[9].mxu0 }
 0x22e   :  { %v1185_v56 = vadd.f32 %v1456_v51, %v1375_v48  ;;  %v1459_v57 = vadd.f32 %v1458_v54, %v1457_v52  ;;  %v1478_v50 = vadd.f32 %v1477_v55, %v1476_v53  ;;  %v1479_v58 = vpop.f32.mrb[10].mxu0 }
 0x22f   :  { %v1480_v59 = vpop.f32.mrb[11].mxu0 }
 0x230   :  { %v1188_v60 = vadd.f32 %v1459_v57, %v1375_v48  ;;  %v1481_v61 = vadd.f32 %v1480_v59, %v1479_v58  ;;  %v1226_v62 = vadd.f32 %v1478_v50, %v1185_v56 }
 0x232   :  { %v1229_v63 = vadd.f32 %v1481_v61, %v1188_v60 }
 0x24b   :  { %v1266_v0 = vpop.f32.mrb[8].mxu1 }
 0x24c   :  { %v1267_v1 = vadd.f32 %v1266_v0, %v1226_v62  ;;  %v1509_v2 = vpop.f32.mrb[9].mxu1 }
 0x24d   :  { %v1269_v3 = vpop.f32.mrb[10].mxu1 }
 0x24e   :  { %1273 = vst [vmem:[#allocation9] sm:$0xff] %v1267_v1  ;;  %v1270_v4 = vadd.f32 %v1269_v3, %v1229_v63  ;;  %v1510_v5 = vpop.f32.mrb[11].mxu1 }
 0x250   :  { %1274 = vst [vmem:[#allocation9 + $0x8] sm:$0xff] %v1270_v4 }
 0x251   :  { %1755 = shalt.err (!%p1752_p0)
}
 0x252   :  { %s1756_s14 = scalar_lea.hbm %s1900_s5, 256 }
 0x253   :  { %p1757_p1 = scmp.ne.s32.totalorder %s1900_s5, %s1756_s14  ;;  %p1760_p2 = scmp.lt.u32.totalorder %s1756_s14, %s1900_s5 }
 0x255   :  { %p1762_p3 = pnand %p1760_p2, %p1757_p1 }
 0x257   :  { %1765 = shalt.err (!%p1762_p3)
}
 0x258   :  { %1286 = dma.vmem_to_hbm [thread:$0]  %s1281_s11, 256, %s1900_s5, [#allocation5], %s1776_s1, %s1776_s1, %s1777_s17  }
 0x259   :  { %1770 = dma.done.wait [#allocation5], 256  }
 0x25a   :  { %1771 = vsyncadd [#allocation5], 4294967040 }
 0x25b   :  { %1290 = vsyncpa [#allocation4], 1 }
 0x25c   :  { %1291 = vsyncpa [#allocation7], 1 }
 0x25d   :  { %1292 = vsyncpa [#allocation5], 1 }

</bundles_post_ra>
